<compile_context>
chip_gen: v6e
topology: v6e:2x2x1
jax: 0.10.0
libtpu: 0.0.40
codegen_flags: <defaults>
</compile_context>

<pallas_src>
import functools

import jax
import jax.numpy as jnp
from jax.experimental import pallas as pl
from jax.experimental.pallas import tpu as pltpu

_LANE = 128


def _round_up(x, m):
    return ((x + m - 1) // m) * m


def _multihead_linear_kernel(x_ref, w_ref, b_ref, o_ref):
    # x_ref: [bb, D] f32, w_ref: [D, Np] bf16, b_ref: [1, Np] bf16,
    # o_ref: [bb, Np] f32   (Np is a multiple of 128 -> lane-dense stores)
    acc = jnp.dot(x_ref[...].astype(jnp.bfloat16), w_ref[...],
                  preferred_element_type=jnp.float32)
    o_ref[...] = acc + b_ref[...].astype(jnp.float32)


@functools.partial(jax.jit, static_argnames=("block_b",))
def multihead_linear(x, w, b, *, block_b=256):
    """Fused linear over all heads.

    x: [B, D] f32, w: [D, Np] bf16, b: [1, Np] bf16 -> [B, Np] f32,
    where Np is the lane-padded total number of classes (multiple of 128).
    """
    B, D = x.shape
    Np = w.shape[1]
    # Row tile: full extent when B is small, otherwise block_b (multiple of 8).
    bb = B if B <= block_b else block_b
    grid_b = pl.cdiv(B, bb)
    return pl.pallas_call(
        _multihead_linear_kernel,
        out_shape=jax.ShapeDtypeStruct((B, Np), jnp.float32),
        grid=(grid_b,),
        in_specs=[
            pl.BlockSpec((bb, D), lambda i: (i, 0)),   # x: tiled over rows
            pl.BlockSpec((D, Np), lambda i: (0, 0)),   # w: VMEM-resident
            pl.BlockSpec((1, Np), lambda i: (0, 0)),   # b: VMEM-resident
        ],
        out_specs=pl.BlockSpec((bb, Np), lambda i: (i, 0)),
        compiler_params=pltpu.CompilerParams(
            dimension_semantics=("parallel",),         # use both TCs on v7x
        ),
    )(x, w, b)


class MultiheadLinearClassificationHeadPallas:
    """JAX/Pallas port of MultiheadLinearClassificationHead."""

    def __init__(self, input_dim, num_classes, category_names=None, key=None):
        self.input_dim = input_dim
        self.num_classes = list(num_classes)
        if category_names is None:
            self.head_names = [f"category_{i}" for i in range(len(num_classes))]
        else:
            self.head_names = list(category_names)

        if key is None:
            key = jax.random.PRNGKey(0)

        # Deterministic init mimicking nn.Linear's uniform(-1/sqrt(D), 1/sqrt(D)).
        ws, bs = [], []
        bound = 1.0 / (input_dim ** 0.5)
        for n in self.num_classes:
            key, kw, kb = jax.random.split(key, 3)
            # torch weight shape is [n, D]; store transposed [D, n] for the kernel.
            w = jax.random.uniform(kw, (input_dim, n), jnp.float32, -bound, bound)
            bvec = jax.random.uniform(kb, (n,), jnp.float32, -bound, bound)
            ws.append(w)
            bs.append(bvec)

        self.n_total = int(sum(self.num_classes))
        self.n_padded = _round_up(max(self.n_total, 1), _LANE)

        w_cat = jnp.concatenate(ws, axis=1)                     # [D, N_total] f32
        b_cat = jnp.concatenate(bs, axis=0)[None, :]            # [1, N_total] f32

        # Zero-pad the output axis up to a multiple of 128 (lane-dense stores),
        # and store parameters in bf16 (f32 accumulate kept inside the kernel).
        pad = self.n_padded - self.n_total
        w_pad = jnp.pad(w_cat, ((0, 0), (0, pad)))
        b_pad = jnp.pad(b_cat, ((0, 0), (0, pad)))
        self.w_cat = w_pad.astype(jnp.bfloat16)                 # [D, Np] bf16
        self.b_cat = b_pad.astype(jnp.bfloat16)                 # [1, Np] bf16

    def __call__(self, sample, input_key="pooled_sequence_feature",
                 output_key="predicted_logits"):
        x = sample[input_key].astype(jnp.float32)               # [B, D]
        logits_padded = multihead_linear(x, self.w_cat, self.b_cat)  # [B, Np]
        logits = logits_padded[:, :self.n_total]                # drop zero-padding
        off = 0
        for name, n in zip(self.head_names, self.num_classes):
            sample[output_key + f"_{name}"] = logits[:, off:off + n]
            off += n
        return sample


def _reference_logits(x, head):
    """Pure-JAX reference with identical dtype handling (bf16 operands, f32 acc)."""
    ref = jnp.dot(x.astype(jnp.bfloat16), head.w_cat,
                  preferred_element_type=jnp.float32)
    ref = ref + head.b_cat.astype(jnp.float32)
    return ref[:, :head.n_total]


if __name__ == "__main__":
    key = jax.random.PRNGKey(0)
    k_x, k_x2, k_p = jax.random.split(key, 3)

    D = 32                    # input_dim (pooled feature dim)
    num_classes = [4, 6, 3]   # three classification heads (N_total = 13 -> padded 128)

    head = MultiheadLinearClassificationHeadPallas(D, num_classes, key=k_p)

    # --- small batch: single full-extent block ---
    B = 8
    x = jax.random.normal(k_x, (B, D), jnp.float32)
    sample = {"pooled_sequence_feature": x}
    sample = head(sample)

    ref = _reference_logits(x, head)
    off = 0
    for name, n in zip(head.head_names, head.num_classes):
        out = sample[f"predicted_logits_{name}"]
        jax.block_until_ready(out)
        assert out.shape == (B, n)
        assert jnp.allclose(out, ref[:, off:off + n], atol=1e-4, rtol=1e-4)
        off += n

    # --- larger batch: exercises the tiled, pipelined grid (grid_b = 2) ---
    B2 = 512
    x2 = jax.random.normal(k_x2, (B2, D), jnp.float32)
    sample2 = head({"pooled_sequence_feature": x2})
    ref2 = _reference_logits(x2, head)
    off = 0
    for name, n in zip(head.head_names, head.num_classes):
        out = sample2[f"predicted_logits_{name}"]
        jax.block_until_ready(out)
        assert out.shape == (B2, n)
        assert jnp.allclose(out, ref2[:, off:off + n], atol=1e-4, rtol=1e-4)
        off += n

    print("KERNEL_OK")
</pallas_src>

<mosaic_0001>
module attributes {stable_mosaic.version = 11 : i64} {
  func.func @_multihead_linear_kernel(%arg0: i32, %arg1: memref<8x32xf32, #tpu.memory_space<vmem>>, %arg2: memref<32x128xbf16, #tpu.memory_space<vmem>>, %arg3: memref<1x128xbf16, #tpu.memory_space<vmem>>, %arg4: memref<8x128xf32, #tpu.memory_space<vmem>>) attributes {dimension_semantics = [#tpu.dimension_semantics<parallel>], iteration_bounds = array<i64: 1>, scalar_prefetch = 0 : i64, scratch_operands = 0 : i64, tpu.core_type = #tpu.core_type<tc>, window_params = [{transform_indices = @transform_0, window_bounds = array<i64: 8, 32>}, {pipeline_mode = #tpu.pipeline_mode<synchronous>, transform_indices = @transform_1, window_bounds = array<i64: 32, 128>}, {pipeline_mode = #tpu.pipeline_mode<synchronous>, transform_indices = @transform_2, window_bounds = array<i64: 1, 128>}, {transform_indices = @transform_3, window_bounds = array<i64: 8, 128>}]} {
    %c0 = arith.constant 0 : index
    %c0_0 = arith.constant 0 : index
    %0 = vector.load %arg1[%c0, %c0_0] : memref<8x32xf32, #tpu.memory_space<vmem>>, vector<8x32xf32>
    %1 = arith.truncf %0 : vector<8x32xf32> to vector<8x32xbf16>
    %c0_1 = arith.constant 0 : index
    %c0_2 = arith.constant 0 : index
    %2 = vector.load %arg2[%c0_1, %c0_2] : memref<32x128xbf16, #tpu.memory_space<vmem>>, vector<32x128xbf16>
    %cst = arith.constant dense<0.000000e+00> : vector<8x128xf32>
    %3 = tpu.matmul %1, %2, %cst {dimension_numbers = #tpu.dot_dimension_numbers<[1], [0], [0], [1], [0, 0, 1, 1], [], []>} : vector<8x32xbf16>, vector<32x128xbf16>, vector<8x128xf32> -> vector<8x128xf32>
    %c0_3 = arith.constant 0 : index
    %c0_4 = arith.constant 0 : index
    %4 = vector.load %arg3[%c0_3, %c0_4] : memref<1x128xbf16, #tpu.memory_space<vmem>>, vector<1x128xbf16>
    %5 = arith.extf %4 : vector<1x128xbf16> to vector<1x128xf32>
    %6 = vector.broadcast %5 : vector<1x128xf32> to vector<8x128xf32>
    %7 = arith.addf %3, %6 : vector<8x128xf32>
    %c0_5 = arith.constant 0 : index
    %c0_6 = arith.constant 0 : index
    %8 = vector.load %arg4[%c0_5, %c0_6] : memref<8x128xf32, #tpu.memory_space<vmem>>, vector<8x128xf32>
    tpu.vector_store %arg4[%c0_5, %c0_6], %7 {strides = array<i32>} : memref<8x128xf32, #tpu.memory_space<vmem>>, vector<8x128xf32>,
    return
  }
  func.func @transform_0(%arg0: i32) -> (i32, i32) {
    %c0_i32 = arith.constant 0 : i32
    %c0_i32_0 = arith.constant 0 : i32
    return %arg0, %c0_i32 : i32, i32
  }
  func.func @transform_1(%arg0: i32) -> (i32, i32) {
    %c0_i32 = arith.constant 0 : i32
    %c0_i32_0 = arith.constant 0 : i32
    %c0_i32_1 = arith.constant 0 : i32
    return %c0_i32, %c0_i32_0 : i32, i32
  }
  func.func @transform_2(%arg0: i32) -> (i32, i32) {
    %c0_i32 = arith.constant 0 : i32
    %c0_i32_0 = arith.constant 0 : i32
    %c0_i32_1 = arith.constant 0 : i32
    return %c0_i32, %c0_i32_0 : i32, i32
  }
  func.func @transform_3(%arg0: i32) -> (i32, i32) {
    %c0_i32 = arith.constant 0 : i32
    %c0_i32_0 = arith.constant 0 : i32
    return %arg0, %c0_i32 : i32, i32
  }
}

</mosaic_0001>

<bundles_post_ra>
// kernel: multihead_linear.1
= control target key start
LH: loop header
LB: loop body
LE: loop exit
PB: predicated region body
PF: predicated region fallthrough
CT: control target
= control target key end

     0   :  { %8 = vsyncpa [#allocation3], 0  ;;  %s255_s0 = inlined_call_operand.hbm [shape: f32[8,32], index: 0, kind: input, shape index: {}]   ;;  %s256_s1 = inlined_call_operand.hbm [shape: bf16[32,128], index: 1, kind: input, shape index: {}]   ;;  %s257_s2 = inlined_call_operand.vmem [shape: bf16[1,128], index: 2, kind: input, shape index: {}]   ;;  %s258_s3 = inlined_call_operand.hbm [shape: f32[8,128], index: 3, kind: output, shape index: {}]  }
   0x1   :  { %9 = vsyncpa [#allocation6], 0 }
   0x2   :  { %10 = vsyncpa [#allocation4], 0  ;;  %s216_s12 = smov [#allocation2]   ;;  %s217_s14 = smov [#allocation5]  }
   0x3   :  { %s17_s13 = sshll.u32 %s216_s12, 4  ;;  %s26_s15 = sshll.u32 %s217_s14, 4  ;;  %s18_s13 = int_to_ptr.vmem [resolvable:$true] %s17_s13  ;;  %s27_s15 = int_to_ptr.vmem [resolvable:$true] %s26_s15 }
   0x4   :  { %s158_s16 = scalar_lea.vmem %s18_s13, 128  ;;  %p163_p1 = scmp.lt.s32.totalorder %s18_s13, %s18_s13 }
   0x5   :  { %p159_p0 = scmp.ne.s32.totalorder %s18_s13, %s158_s16  ;;  %p164_p2 = scmp.lt.s32.totalorder %s158_s16, %s158_s16 }
   0x7   :  { %p165_p3 = por %p164_p2, %p163_p1 }
   0x9   :  { %p166_p4 = pnand %p165_p3, %p159_p0 }
   0xb   :  { %169 = shalt.err (!%p166_p4)
}
   0xc   :  { %20 = dma.hbm_to_vmem [thread:$0]  %s255_s0, 128, %s18_s13, [#allocation3]  }
   0xd   :  { %s178_s19 = scalar_lea.vmem %s27_s15, 256  ;;  %p183_p6 = scmp.lt.s32.totalorder %s27_s15, %s27_s15 }
   0xe   :  { %p179_p5 = scmp.ne.s32.totalorder %s27_s15, %s178_s19  ;;  %p184_p7 = scmp.lt.s32.totalorder %s178_s19, %s178_s19 }
  0x10   :  { %p185_p8 = por %p184_p7, %p183_p6 }
  0x12   :  { %p186_p9 = pnand %p185_p8, %p179_p5 }
  0x14   :  { %189 = shalt.err (!%p186_p9)
}
  0x15   :  { %s218_s20 = smov 64   ;;  %s219_s21 = smov 4  }
  0x16   :  { %32 = dma.hbm_to_vmem [thread:$0]  %s256_s1, 256, %s27_s15, [#allocation6], %s218_s20, %s218_s20, %s219_s21  }
  0x17   :  { %210 = dma.done.wait [#allocation3], 128  }
  0x18   :  { %211 = vsyncadd [#allocation3], 4294967168 }
  0x19   :  { %212 = dma.done.wait [#allocation6], 256  }
  0x1a   :  { %213 = vsyncadd [#allocation6], 4294967040  ;;  %v220_v0 = vmov 0.0   ;;  %vm221_vm0 = vmmov 0   ;;  %v148_v1 = vld [vmem:[#allocation5 + $0x8] sm:$0xff]   ;;  %v149_v2 = vld [vmem:[#allocation5] sm:$0xff]   ;;  %v50_v5 = vlaneseq }
  0x1b   :  { %133 = vmatprep.subr.bf16.mxu0 %v220_v0  ;;  %137 = vmatprep.mubr.msk.bf16.mxu0 %vm221_vm0, %v220_v0  ;;  %v42_v3 = vld [vmem:[#allocation2] sm:$0xff]  ;;  %vm66_vm1 = vcmask 261120   ;;  %s222_s24 = smov [#allocation7]  }
  0x1c   :  { %134 = vmatpush3.bf16.msra.mxu0 %v148_v1  ;;  %v43_v4 = vpack.c.bf16 %v42_v3, %v42_v3  ;;  %v51_v6 = vshrl.u32 %v50_v5, 7  ;;  %v48_v7 = vld [vmem:[%s257_s2] sm:$0x1]  ;;  %s117_s25 = sshll.u32 %s222_s24, 4  ;;  %s118_s25 = int_to_ptr.vmem [resolvable:$true] %s117_s25 }
  0x1d   :  { %135 = vmatprep.subr.bf16.mxu0 %v220_v0  ;;  %v49_v8 = vunpack.c.l.bf16 %v48_v7  ;;  %s190_s26 = scalar_lea.vmem %s118_s25, 128  ;;  %p195_p11 = scmp.lt.s32.totalorder %s118_s25, %s118_s25 }
  0x1e   :  { %v52_v9 = vsub.s32 0, %v51_v6  ;;  %p191_p10 = scmp.ne.s32.totalorder %s118_s25, %s190_s26  ;;  %p196_p12 = scmp.lt.s32.totalorder %s190_s26, %s190_s26 }
  0x20   :  { %136 = vmatpush3.bf16.msra.mxu0 %v149_v2  ;;  %v53_v10 = vrot.slane %v49_v8, %v52_v9  ;;  %p197_p13 = por %p196_p12, %p195_p11 }
  0x22   :  { %p198_p0 = pnand %p197_p13, %p191_p10 }
  0x23   :  { %138 = vmatmul.mubr.msk.bf16.vlgmr.msra.gmra.mxu0 %vm66_vm1, %v43_v4 }
  0xe3   :  { %v104_v11 = vpop.f32.mrf.mxu0 }
  0xe4   :  { %v105_v12 = vadd.f32 %v104_v11, %v53_v10 }
  0xe5   :  { %v139_v13 = vpop.f32.mrf.mxu0 }
  0xe6   :  { %110 = vst [vmem:[#allocation7] sm:$0xff] %v105_v12 }
  0xe7   :  { %v107_v14 = vpop.f32.mrf.mxu0 }
  0xe8   :  { %201 = shalt.err (!%p198_p0)
}
  0xe9   :  { %120 = dma.vmem_to_hbm [thread:$0]  %s118_s25, 128, %s258_s3, [#allocation4]   ;;  %v140_v15 = vpop.f32.mrf.mxu0 }
  0xea   :  { %214 = dma.done.wait [#allocation4], 128  }
  0xeb   :  { %215 = vsyncadd [#allocation4], 4294967168 }
  0xec   :  { %124 = vsyncpa [#allocation3], 1 }
  0xed   :  { %125 = vsyncpa [#allocation6], 1 }
  0xee   :  { %126 = vsyncpa [#allocation4], 1 }

</bundles_post_ra>
